<compile_context>
chip_gen: v5e
topology: v5e:2x2
jax: 0.10.0
libtpu: 0.0.40
codegen_flags: <defaults>
</compile_context>

<pallas_src>
import functools

import jax
import jax.numpy as jnp
from jax.experimental import pallas as pl
from jax.experimental.pallas import tpu as pltpu

_LANE = 128
_NUM_CORES = 2  # megacore split (v7x); harmless on single-TC v5e/v6e.

# Per-row VMEM overhead independent of C: labels block (int32, double-buffered,
# lane-padded to 128) + three f32 scratch rows (m, l, x_at_label), lane-padded.
_ROW_OVERHEAD_BYTES = (2 * 4 + 3 * 4) * _LANE


def _ce_loss_kernel(logits_ref, labels_ref, out_ref,
                    acc_ref, m_ref, l_ref, xlab_ref,
                    *, total_b, total_c, tiles_per_core):
    core = pl.program_id(0)   # parallel (megacore) axis
    i = pl.program_id(1)      # row-tile index within this core's batch slice
    k = pl.program_id(2)      # class-chunk index (online logsumexp)
    n_i = pl.num_programs(1)
    n_k = pl.num_programs(2)

    @pl.when(jnp.logical_and(i == 0, k == 0))
    def _():
        acc_ref[...] = jnp.zeros_like(acc_ref)

    # Reset the per-row running-logsumexp state at the start of every row tile.
    @pl.when(k == 0)
    def _():
        m_ref[...] = jnp.full(m_ref.shape, -jnp.inf, dtype=m_ref.dtype)
        l_ref[...] = jnp.zeros_like(l_ref)
        xlab_ref[...] = jnp.zeros_like(xlab_ref)

    # All math in f32 regardless of stored dtype (v5e has no bf16 VPU/EUP).
    x = logits_ref[...].astype(jnp.float32)          # [TB, TC]
    lab = labels_ref[...]                            # [TB, 1] int32
    tb, tc = x.shape

    # Global class indices of this chunk; mask a possibly-partial last chunk.
    col = jax.lax.broadcasted_iota(jnp.int32, (tb, tc), 1) + k * tc
    col_valid = col < total_c
    x_masked = jnp.where(col_valid, x, -jnp.inf)

    # Online (running) log-sum-exp update along the class (lane) axis.
    m_old = m_ref[...]
    m_new = jnp.maximum(m_old, jnp.max(x_masked, axis=-1, keepdims=True))
    alpha = jnp.exp(m_old - m_new)
    p = jnp.exp(x_masked - m_new)
    l_ref[...] = alpha * l_ref[...] + jnp.sum(p, axis=-1, keepdims=True)
    m_ref[...] = m_new

    # Gather x[row, label[row]] restricted to this chunk's class range
    # (hard labels; invalid/padded columns never match a valid label index).
    xlab_ref[...] += jnp.sum(jnp.where(col == lab, x, 0.0),
                             axis=-1, keepdims=True)

    @pl.when(k == n_k - 1)
    def _():
        per_row = (m_ref[...] + jnp.log(l_ref[...])) - xlab_ref[...]   # [TB,1]
        # Mask rows of partial / past-the-end batch tiles before the sublane
        # reduce (padded rows may hold garbage — keep this mask ahead of it).
        row = jax.lax.broadcasted_iota(jnp.int32, (tb, 1), 0)
        global_row = (core * tiles_per_core + i) * tb + row
        per_row = jnp.where(global_row < total_b, per_row, 0.0)
        acc_ref[...] += jnp.sum(per_row, axis=0, keepdims=True)        # (1,1)

    @pl.when(jnp.logical_and(i == n_i - 1, k == n_k - 1))
    def _():
        # Lane-dense (1, 8, 128) output block per core; wrapper reads [:,0,0].
        out_ref[...] = jnp.broadcast_to(acc_ref[...].reshape(1, 1, 1),
                                        out_ref.shape)


def _vmem_config():
    """Explicit scoped-VMEM limit + per-tile f32-footprint budget."""
    vmem_limit = 32 * 1024 * 1024          # safe on v5e/v6e (128 MiB) & v7x (64 MiB)
    try:
        phys = pltpu.get_tpu_info().vmem_capacity_bytes
        vmem_limit = min(vmem_limit, phys // 2)
    except Exception:
        pass
    # Leave headroom for pipeline buffers of labels/output and compiler scratch.
    tile_budget = vmem_limit // 3
    return vmem_limit, tile_budget


def _pick_tiles(b, c, itemsize, tile_budget):
    """Pick (tile_b, tile_c) from the f32 *compute* footprint of one tile:
    double-buffered stored-dtype logits stream + ~3x full-tile f32 temporaries
    (upcast / exp / where) + lane-padded per-row labels & scratch overhead."""
    # Sub-32-bit dtypes pack along sublanes: 16-row align for bf16, 32 for int8.
    align = 8 if itemsize >= 4 else (16 if itemsize == 2 else 32)
    bytes_per_elem = 2 * itemsize + 3 * 4

    rows = tile_budget // max(1, c * bytes_per_elem + _ROW_OVERHEAD_BYTES)
    if rows >= b:
        return b, c                                   # full batch, full C
    if rows >= align:
        return (rows // align) * align, c             # full-C row tiles

    # Large-vocab path: tile the class axis; kernel runs online logsumexp.
    tile_b = b if b < align else align
    tile_c = (tile_budget // tile_b - _ROW_OVERHEAD_BYTES) // bytes_per_elem
    tile_c = max(_LANE, (tile_c // _LANE) * _LANE)
    tile_c = min(tile_c, c)
    return tile_b, tile_c


def base_classification_loss(logits, code_logits, labels, onehot=True,
                             tile_b=None, tile_c=None):
    """Mean softmax cross-entropy (the loss BaseClassificationLoss implies).

    logits:      f32/bf16 [B, C]
    code_logits: [B, K]   (unused — kept for signature parity with the module)
    labels:      one-hot [B, C] if onehot=True, else integer indices [B]
    returns:     f32 scalar

    NOTE: onehot=True converts to hard labels via argmax (exact only for true
    one-hot labels; soft / label-smoothed targets are NOT supported). Prefer
    onehot=False with integer labels upstream — it removes a full [B, C]
    un-fused argmax pass over HBM.
    """
    del code_logits  # unused in the base class
    b, c = logits.shape

    if onehot:
        label_idx = jnp.argmax(labels, axis=-1).astype(jnp.int32)
    else:
        label_idx = labels.astype(jnp.int32)
    label_idx = label_idx.reshape(b, 1)

    vmem_limit, tile_budget = _vmem_config()
    auto_tb, auto_tc = _pick_tiles(b, c, jnp.dtype(logits.dtype).itemsize,
                                   tile_budget)
    tile_b = auto_tb if tile_b is None else tile_b
    tile_c = auto_tc if tile_c is None else tile_c

    n_row_blocks = pl.cdiv(b, tile_b)
    tiles_per_core = pl.cdiv(n_row_blocks, _NUM_CORES)
    n_c_blocks = pl.cdiv(c, tile_c)
    grid = (_NUM_CORES, tiles_per_core, n_c_blocks)

    def logits_map(core, i, k):
        rb = jnp.minimum(core * tiles_per_core + i, n_row_blocks - 1)
        return rb, k

    def labels_map(core, i, k):
        rb = jnp.minimum(core * tiles_per_core + i, n_row_blocks - 1)
        return rb, 0

    kernel = functools.partial(_ce_loss_kernel, total_b=b, total_c=c,
                               tiles_per_core=tiles_per_core)

    partials = pl.pallas_call(
        kernel,
        out_shape=jax.ShapeDtypeStruct((_NUM_CORES, 8, _LANE), jnp.float32),
        grid_spec=pl.GridSpec(
            grid=grid,
            in_specs=[
                pl.BlockSpec((tile_b, tile_c), logits_map),
                pl.BlockSpec((tile_b, 1), labels_map),
            ],
            out_specs=pl.BlockSpec((1, 8, _LANE), lambda core, i, k: (core, 0, 0)),
            scratch_shapes=[
                pltpu.VMEM((1, 1), jnp.float32),        # running loss sum
                pltpu.VMEM((tile_b, 1), jnp.float32),   # running row max
                pltpu.VMEM((tile_b, 1), jnp.float32),   # running row sum-exp
                pltpu.VMEM((tile_b, 1), jnp.float32),   # x at label
            ],
        ),
        compiler_params=pltpu.CompilerParams(
            dimension_semantics=("parallel", "arbitrary", "arbitrary"),
            vmem_limit_bytes=vmem_limit,
        ),
    )(logits, label_idx)

    return jnp.sum(partials[:, 0, 0]) * (1.0 / b)


if __name__ == "__main__":
    key = jax.random.PRNGKey(0)
    k1, k2, k3, k4, k5 = jax.random.split(key, 5)

    # --- Test 1: small shapes, single tile, both onehot paths ---------------
    B, C, K = 8, 32, 16  # batch, num classes, code length
    logits = jax.random.normal(k1, (B, C), dtype=jnp.float32)
    code_logits = jax.random.normal(k2, (B, K), dtype=jnp.float32)
    label_idx = jax.random.randint(k3, (B,), 0, C)
    labels_onehot = jax.nn.one_hot(label_idx, C, dtype=jnp.float32)

    loss = jax.block_until_ready(
        base_classification_loss(logits, code_logits, labels_onehot, onehot=True))
    loss_idx = jax.block_until_ready(
        base_classification_loss(logits, code_logits, label_idx, onehot=False))

    ref = jnp.mean(
        -jnp.sum(labels_onehot * jax.nn.log_softmax(logits, axis=-1), axis=-1))
    assert jnp.allclose(loss, ref, atol=1e-5, rtol=1e-5), (loss, ref)
    assert jnp.allclose(loss_idx, ref, atol=1e-5, rtol=1e-5), (loss_idx, ref)

    # --- Test 2: force small tiles to exercise the 2-core batch split,
    #             partial row tiles, and the online-logsumexp class chunks
    #             (including a partial last class chunk). --------------------
    B2, C2 = 20, 200
    logits2 = jax.random.normal(k4, (B2, C2), dtype=jnp.float32)
    idx2 = jax.random.randint(k5, (B2,), 0, C2)
    loss2 = jax.block_until_ready(
        base_classification_loss(logits2, None, idx2, onehot=False,
                                 tile_b=8, tile_c=128))
    ref2 = jnp.mean(
        -jax.nn.log_softmax(logits2, axis=-1)[jnp.arange(B2), idx2])
    assert jnp.allclose(loss2, ref2, atol=1e-4, rtol=1e-5), (loss2, ref2)

    print("KERNEL_OK")
</pallas_src>

<mosaic_0001>
module attributes {stable_mosaic.version = 11 : i64} {
  func.func @_ce_loss_kernel(%arg0: i32, %arg1: i32, %arg2: i32, %arg3: memref<8x32xf32, #tpu.memory_space<vmem>>, %arg4: memref<8x1xi32, #tpu.memory_space<vmem>>, %arg5: memref<1x8x128xf32, #tpu.memory_space<vmem>>, %arg6: memref<1x1xf32, #tpu.memory_space<vmem>>, %arg7: memref<8x1xf32, #tpu.memory_space<vmem>>, %arg8: memref<8x1xf32, #tpu.memory_space<vmem>>, %arg9: memref<8x1xf32, #tpu.memory_space<vmem>>) attributes {dimension_semantics = [#tpu.dimension_semantics<parallel>, #tpu.dimension_semantics<arbitrary>, #tpu.dimension_semantics<arbitrary>], iteration_bounds = array<i64: 2, 1, 1>, scalar_prefetch = 0 : i64, scratch_operands = 4 : i64, tpu.core_type = #tpu.core_type<tc>, window_params = [{transform_indices = @transform_0, window_bounds = array<i64: 8, 32>}, {transform_indices = @transform_1, window_bounds = array<i64: 8, 1>}, {transform_indices = @transform_2, window_bounds = array<i64: 1, 8, 128>}]} {
    %c0_i32 = arith.constant 0 : i32
    %0 = arith.cmpi eq, %arg1, %c0_i32 : i32
    %c0_i32_0 = arith.constant 0 : i32
    %1 = arith.cmpi eq, %arg2, %c0_i32_0 : i32
    %2 = arith.andi %0, %1 : i1
    %3 = arith.extui %2 : i1 to i32
    %c0_i32_1 = arith.constant 0 : i32
    %4 = arith.cmpi ne, %3, %c0_i32_1 : i32
    scf.if %4 {
      %cst_29 = arith.constant 0.000000e+00 : f32
      %51 = vector.broadcast %cst_29 : f32 to vector<1x1xf32>
      %c0_30 = arith.constant 0 : index
      %c0_31 = arith.constant 0 : index
      %52 = vector.load %arg6[%c0_30, %c0_31] : memref<1x1xf32, #tpu.memory_space<vmem>>, vector<1x1xf32>
      tpu.vector_store %arg6[%c0_30, %c0_31], %51 {strides = array<i32>} : memref<1x1xf32, #tpu.memory_space<vmem>>, vector<1x1xf32>,
    } else {
    }
    %c0_i32_2 = arith.constant 0 : i32
    %5 = arith.cmpi eq, %arg2, %c0_i32_2 : i32
    %6 = arith.extui %5 : i1 to i32
    %c0_i32_3 = arith.constant 0 : i32
    %7 = arith.cmpi ne, %6, %c0_i32_3 : i32
    scf.if %7 {
      %cst_29 = arith.constant 0xFF800000 : f32
      %51 = vector.broadcast %cst_29 : f32 to vector<8x1xf32>
      %c0_30 = arith.constant 0 : index
      %c0_31 = arith.constant 0 : index
      %52 = vector.load %arg7[%c0_30, %c0_31] : memref<8x1xf32, #tpu.memory_space<vmem>>, vector<8x1xf32>
      tpu.vector_store %arg7[%c0_30, %c0_31], %51 {strides = array<i32>} : memref<8x1xf32, #tpu.memory_space<vmem>>, vector<8x1xf32>,
      %cst_32 = arith.constant 0.000000e+00 : f32
      %53 = vector.broadcast %cst_32 : f32 to vector<8x1xf32>
      %c0_33 = arith.constant 0 : index
      %c0_34 = arith.constant 0 : index
      %54 = vector.load %arg8[%c0_33, %c0_34] : memref<8x1xf32, #tpu.memory_space<vmem>>, vector<8x1xf32>
      tpu.vector_store %arg8[%c0_33, %c0_34], %53 {strides = array<i32>} : memref<8x1xf32, #tpu.memory_space<vmem>>, vector<8x1xf32>,
      %cst_35 = arith.constant 0.000000e+00 : f32
      %55 = vector.broadcast %cst_35 : f32 to vector<8x1xf32>
      %c0_36 = arith.constant 0 : index
      %c0_37 = arith.constant 0 : index
      %56 = vector.load %arg9[%c0_36, %c0_37] : memref<8x1xf32, #tpu.memory_space<vmem>>, vector<8x1xf32>
      tpu.vector_store %arg9[%c0_36, %c0_37], %55 {strides = array<i32>} : memref<8x1xf32, #tpu.memory_space<vmem>>, vector<8x1xf32>,
    } else {
    }
    %c0 = arith.constant 0 : index
    %c0_4 = arith.constant 0 : index
    %8 = vector.load %arg3[%c0, %c0_4] : memref<8x32xf32, #tpu.memory_space<vmem>>, vector<8x32xf32>
    %c0_5 = arith.constant 0 : index
    %c0_6 = arith.constant 0 : index
    %9 = vector.load %arg4[%c0_5, %c0_6] : memref<8x1xi32, #tpu.memory_space<vmem>>, vector<8x1xi32>
    %10 = tpu.iota {dimensions = array<i32: 1>} : vector<8x32xi32>
    %c32_i32 = arith.constant 32 : i32
    %11 = arith.muli %arg2, %c32_i32 : i32
    %12 = vector.broadcast %11 : i32 to vector<8x32xi32>
    %13 = arith.addi %10, %12 : vector<8x32xi32>
    %c32_i32_7 = arith.constant 32 : i32
    %14 = vector.broadcast %c32_i32_7 : i32 to vector<8x32xi32>
    %15 = arith.cmpi slt, %13, %14 : vector<8x32xi32>
    %cst = arith.constant 0xFF800000 : f32
    %16 = vector.broadcast %cst : f32 to vector<8x32xf32>
    %17 = arith.select %15, %8, %16 : vector<8x32xi1>, vector<8x32xf32>
    %c0_8 = arith.constant 0 : index
    %c0_9 = arith.constant 0 : index
    %18 = vector.load %arg7[%c0_8, %c0_9] : memref<8x1xf32, #tpu.memory_space<vmem>>, vector<8x1xf32>
    %cst_10 = arith.constant dense<0xFF800000> : vector<8xf32>
    %19 = vector.multi_reduction <maximumf>, %17, %cst_10 [1] : vector<8x32xf32> to vector<8xf32>
    %20 = vector.shape_cast %19 : vector<8xf32> to vector<8x1xf32>
    %21 = arith.maximumf %18, %20 : vector<8x1xf32>
    %22 = arith.subf %18, %21 : vector<8x1xf32>
    %23 = math.exp %22 : vector<8x1xf32>
    %24 = vector.broadcast %21 : vector<8x1xf32> to vector<8x32xf32>
    %25 = arith.subf %17, %24 : vector<8x32xf32>
    %26 = math.exp %25 : vector<8x32xf32>
    %c0_11 = arith.constant 0 : index
    %c0_12 = arith.constant 0 : index
    %27 = vector.load %arg8[%c0_11, %c0_12] : memref<8x1xf32, #tpu.memory_space<vmem>>, vector<8x1xf32>
    %28 = arith.mulf %23, %27 : vector<8x1xf32>
    %cst_13 = arith.constant dense<0.000000e+00> : vector<8xf32>
    %29 = vector.multi_reduction <add>, %26, %cst_13 [1] : vector<8x32xf32> to vector<8xf32>
    %30 = vector.shape_cast %29 : vector<8xf32> to vector<8x1xf32>
    %31 = arith.addf %28, %30 : vector<8x1xf32>
    %c0_14 = arith.constant 0 : index
    %c0_15 = arith.constant 0 : index
    %32 = vector.load %arg8[%c0_14, %c0_15] : memref<8x1xf32, #tpu.memory_space<vmem>>, vector<8x1xf32>
    tpu.vector_store %arg8[%c0_14, %c0_15], %31 {strides = array<i32>} : memref<8x1xf32, #tpu.memory_space<vmem>>, vector<8x1xf32>,
    %c0_16 = arith.constant 0 : index
    %c0_17 = arith.constant 0 : index
    %33 = vector.load %arg7[%c0_16, %c0_17] : memref<8x1xf32, #tpu.memory_space<vmem>>, vector<8x1xf32>
    tpu.vector_store %arg7[%c0_16, %c0_17], %21 {strides = array<i32>} : memref<8x1xf32, #tpu.memory_space<vmem>>, vector<8x1xf32>,
    %c0_18 = arith.constant 0 : index
    %c0_19 = arith.constant 0 : index
    %34 = vector.load %arg9[%c0_18, %c0_19] : memref<8x1xf32, #tpu.memory_space<vmem>>, vector<8x1xf32>
    %35 = vector.broadcast %9 : vector<8x1xi32> to vector<8x32xi32>
    %36 = arith.cmpi eq, %13, %35 : vector<8x32xi32>
    %cst_20 = arith.constant 0.000000e+00 : f32
    %37 = vector.broadcast %cst_20 : f32 to vector<8x32xf32>
    %38 = arith.select %36, %8, %37 : vector<8x32xi1>, vector<8x32xf32>
    %cst_21 = arith.constant dense<0.000000e+00> : vector<8xf32>
    %39 = vector.multi_reduction <add>, %38, %cst_21 [1] : vector<8x32xf32> to vector<8xf32>
    %40 = vector.shape_cast %39 : vector<8xf32> to vector<8x1xf32>
    %41 = arith.addf %34, %40 : vector<8x1xf32>
    %c0_22 = arith.constant 0 : index
    %c0_23 = arith.constant 0 : index
    %42 = vector.load %arg9[%c0_22, %c0_23] : memref<8x1xf32, #tpu.memory_space<vmem>>, vector<8x1xf32>
    tpu.vector_store %arg9[%c0_22, %c0_23], %41 {strides = array<i32>} : memref<8x1xf32, #tpu.memory_space<vmem>>, vector<8x1xf32>,
    %c0_i32_24 = arith.constant 0 : i32
    %43 = arith.cmpi eq, %arg2, %c0_i32_24 : i32
    %44 = arith.extui %43 : i1 to i32
    %c0_i32_25 = arith.constant 0 : i32
    %45 = arith.cmpi ne, %44, %c0_i32_25 : i32
    scf.if %45 {
      %c0_29 = arith.constant 0 : index
      %c0_30 = arith.constant 0 : index
      %51 = vector.load %arg7[%c0_29, %c0_30] : memref<8x1xf32, #tpu.memory_space<vmem>>, vector<8x1xf32>
      %c0_31 = arith.constant 0 : index
      %c0_32 = arith.constant 0 : index
      %52 = vector.load %arg8[%c0_31, %c0_32] : memref<8x1xf32, #tpu.memory_space<vmem>>, vector<8x1xf32>
      %53 = math.log %52 : vector<8x1xf32>
      %54 = arith.addf %51, %53 : vector<8x1xf32>
      %c0_33 = arith.constant 0 : index
      %c0_34 = arith.constant 0 : index
      %55 = vector.load %arg9[%c0_33, %c0_34] : memref<8x1xf32, #tpu.memory_space<vmem>>, vector<8x1xf32>
      %56 = arith.subf %54, %55 : vector<8x1xf32>
      %57 = tpu.iota {dimensions = array<i32: 0>} : vector<8x1xi32>
      %c1_i32 = arith.constant 1 : i32
      %58 = arith.muli %arg0, %c1_i32 : i32
      %59 = arith.addi %58, %arg1 : i32
      %c8_i32 = arith.constant 8 : i32
      %60 = arith.muli %59, %c8_i32 : i32
      %61 = vector.broadcast %60 : i32 to vector<8x1xi32>
      %62 = arith.addi %61, %57 : vector<8x1xi32>
      %c8_i32_35 = arith.constant 8 : i32
      %63 = vector.broadcast %c8_i32_35 : i32 to vector<8x1xi32>
      %64 = arith.cmpi slt, %62, %63 : vector<8x1xi32>
      %cst_36 = arith.constant 0.000000e+00 : f32
      %65 = vector.broadcast %cst_36 : f32 to vector<8x1xf32>
      %66 = arith.select %64, %56, %65 : vector<8x1xi1>, vector<8x1xf32>
      %c0_37 = arith.constant 0 : index
      %c0_38 = arith.constant 0 : index
      %67 = vector.load %arg6[%c0_37, %c0_38] : memref<1x1xf32, #tpu.memory_space<vmem>>, vector<1x1xf32>
      %cst_39 = arith.constant dense<0.000000e+00> : vector<1xf32>
      %68 = vector.multi_reduction <add>, %66, %cst_39 [0] : vector<8x1xf32> to vector<1xf32>
      %69 = vector.shape_cast %68 : vector<1xf32> to vector<1x1xf32>
      %70 = arith.addf %67, %69 : vector<1x1xf32>
      %c0_40 = arith.constant 0 : index
      %c0_41 = arith.constant 0 : index
      %71 = vector.load %arg6[%c0_40, %c0_41] : memref<1x1xf32, #tpu.memory_space<vmem>>, vector<1x1xf32>
      tpu.vector_store %arg6[%c0_40, %c0_41], %70 {strides = array<i32>} : memref<1x1xf32, #tpu.memory_space<vmem>>, vector<1x1xf32>,
    } else {
    }
    %c0_i32_26 = arith.constant 0 : i32
    %46 = arith.cmpi eq, %arg1, %c0_i32_26 : i32
    %c0_i32_27 = arith.constant 0 : i32
    %47 = arith.cmpi eq, %arg2, %c0_i32_27 : i32
    %48 = arith.andi %46, %47 : i1
    %49 = arith.extui %48 : i1 to i32
    %c0_i32_28 = arith.constant 0 : i32
    %50 = arith.cmpi ne, %49, %c0_i32_28 : i32
    scf.if %50 {
      %c0_29 = arith.constant 0 : index
      %c0_30 = arith.constant 0 : index
      %51 = vector.load %arg6[%c0_29, %c0_30] : memref<1x1xf32, #tpu.memory_space<vmem>>, vector<1x1xf32>
      %52 = vector.shape_cast %51 : vector<1x1xf32> to vector<1x1x1xf32>
      %53 = vector.shape_cast %52 : vector<1x1x1xf32> to vector<1x1x1xf32>
      %54 = vector.broadcast %53 : vector<1x1x1xf32> to vector<1x8x128xf32>
      %c0_31 = arith.constant 0 : index
      %c0_32 = arith.constant 0 : index
      %c0_33 = arith.constant 0 : index
      %55 = vector.load %arg5[%c0_31, %c0_32, %c0_33] : memref<1x8x128xf32, #tpu.memory_space<vmem>>, vector<1x8x128xf32>
      tpu.vector_store %arg5[%c0_31, %c0_32, %c0_33], %54 {strides = array<i32>} : memref<1x8x128xf32, #tpu.memory_space<vmem>>, vector<1x8x128xf32>,
    } else {
    }
    return
  }
  func.func @transform_0(%arg0: i32, %arg1: i32, %arg2: i32) -> (i32, i32) {
    %c1_i32 = arith.constant 1 : i32
    %0 = arith.muli %arg0, %c1_i32 : i32
    %1 = arith.addi %0, %arg1 : i32
    %c0_i32 = arith.constant 0 : i32
    %2 = arith.minsi %1, %c0_i32 : i32
    %c0_i32_0 = arith.constant 0 : i32
    return %2, %arg2 : i32, i32
  }
  func.func @transform_1(%arg0: i32, %arg1: i32, %arg2: i32) -> (i32, i32) {
    %c1_i32 = arith.constant 1 : i32
    %0 = arith.muli %arg0, %c1_i32 : i32
    %1 = arith.addi %0, %arg1 : i32
    %c0_i32 = arith.constant 0 : i32
    %2 = arith.minsi %1, %c0_i32 : i32
    %c0_i32_0 = arith.constant 0 : i32
    %c0_i32_1 = arith.constant 0 : i32
    return %2, %c0_i32_0 : i32, i32
  }
  func.func @transform_2(%arg0: i32, %arg1: i32, %arg2: i32) -> (i32, i32, i32) {
    %c0_i32 = arith.constant 0 : i32
    %c0_i32_0 = arith.constant 0 : i32
    %c0_i32_1 = arith.constant 0 : i32
    return %arg0, %c0_i32, %c0_i32_0 : i32, i32, i32
  }
}

</mosaic_0001>

<bundles_post_ra>
// kernel: tpu_custom_call.1
= control target key start
LH: loop header
LB: loop body
LE: loop exit
PB: predicated region body
PF: predicated region fallthrough
CT: control target
= control target key end

     0   :  { %7 = vsyncpa [#allocation7], 0  ;;  %s726_s0 = inlined_call_operand.vmem [shape: f32[8,32], index: 0, kind: input, shape index: {}]   ;;  %s727_s1 = inlined_call_operand.vmem [shape: s32[8,1], index: 1, kind: input, shape index: {}]   ;;  %s728_s2 = inlined_call_operand.hbm [shape: f32[2,8,128], index: 2, kind: output, shape index: {}]  }
   0x1   :  { %9 = vsyncpa [#allocation7 + $0x1], 0  ;;  %s614_s9 = smov 0   ;;  %s616_s10 = smov 0  }
   0x2   :  { %s618_s11 = smov 0   ;;  %s620_s12 = smov 0  }
   0x3   :  { %s622_s13 = smov 0   ;;  %s624_s14 = smov 0  }
   0x4 LB: > { %s429_s15 = sadd.s32 4294967295, %s594_s14   ;;  %s430_s16 = sadd.s32 4294967294, %s594_s14   ;;  %s594_s14 = sphi %s624_s14, %s15_s14   ;;  %s590_s13 = sphi %s622_s13, %s735_s13   ;;  %s586_s12 = sphi %s620_s12, %s734_s12   ;;  %s582_s11 = sphi %s618_s11, %s733_s11   ;;  %s578_s10 = sphi %s616_s10, %s732_s10   ;;  %s574_s9 = sphi %s614_s9, %s731_s9  }
   0x5   : > { %s34_s17 = sadd.s32 1, %s590_s13  ;;  %s107_s18 = sadd.s32 1, %s582_s11 }
   0x6   : > { %p36_p0 = scmp.ge.s32.totalorder %s34_s17, 2  ;;  %p117_p1 = scmp.ne.s32.totalorder %s582_s11, %s578_s10 }
   0x7   : > { %p118_p2 = scmp.eq.s32.totalorder %s429_s15, 1  ;;  %p123_p3 = scmp.ne.s32.totalorder %s578_s10, %s574_s9 }
   0x8   : > { %s737_s17 = smov (%p36_p0, %s34_s17), 0  ;;  %p124_p5 = scmp.eq.s32.totalorder %s430_s16, 1 }
   0x9   : > { %p654_p4 = por %p118_p2, %p117_p1  ;;  %s104_s20 = ssub.s32 %s590_s13, %s737_s17 }
   0xa   : > { %p433_p6 = scmp.ge.s32.totalorder %s594_s14, 1  ;;  %p105_p7 = scmp.eq.s32.totalorder %s104_s20, 0 }
   0xb   : > { %p661_p8 = por %p124_p5, %p123_p3  ;;  %p171_p9 = scmp.lt.s32.totalorder %s594_s14, 3 }
   0xc   : > { %s667_s22 = scalar_select %p105_p7, %s582_s11, %s107_s18  }
   0xd   : > { %p172_p10 = pnand %p433_p6, %p171_p9 }
   0xe   : > { %p206_p11 = scmp.lt.s32.totalorder (!%p172_p10), %s586_s12, 0  ;;  %s443_s3 = sshll.u32 (!%p172_p10), %s586_s12, 3 }
   0xf   : > { %175 = sbr.rel (%p172_p10) target bundleno = 530 (0x212), region = 28  ;;  %s202_s4 = sand.u32 (!%p172_p10), 1, %s578_s10  }
  0x10   : > { %s434_s5 = sshll.u32 (!%p172_p10), %s202_s4, 3  ;;  %s339_s8 = scalar_lea.hbm (!%p172_p10), %s728_s2, %s443_s3 }
  0x11   : > { %s343_s16 = sshll.u32 (!%p172_p10), %s339_s8, 4  ;;  %s329_s18 = scalar_lea.sflag (!%p172_p10), [#allocation7], %s202_s4  ;;  %s344_s16 = int_to_ptr.hbm [resolvable:$true] %s343_s16 }
  0x12   : > { %s530_s20 = sshra.s32 (!%p172_p10), %s344_s16, 4  ;;  %s536_s26 = scalar_lea.hbm (!%p172_p10), %s728_s2, 16  ;;  %s531_s20 = int_to_ptr.hbm [resolvable:$true] %s530_s20 }
  0x13   : > { %p537_p1 = scmp.lt.s32.totalorder (!%p172_p10), %s531_s20, %s728_s2 }
  0x14   : > { %v245_v0 = vlaneseq  ;;  %vm239_vm0 = vcmask 7168   ;;  %v596_v1 = vmov -inf   ;;  %s207_s23 = scalar_select %p206_p11, %s586_s12, 0  ;;  %vm253_vm2 = vcmask 261120  }
  0x15   : > { %240 = vst.msk [vmem:[#allocation3] sm:$0xff] %vm239_vm0, %v596_v1  ;;  %v597_v6 = vmov 0   ;;  %v598_v7 = vmov 0.0   ;;  %vm234_vm3 = vcmask 0   ;;  %v303_v32 = vstv %s443_s3  ;;  %s204_s12 = scalar_lea.vmem [#allocation6], %s434_s5 }
  0x16   : > { %v246_v2 = vand.u32 127, %v245_v0  ;;  %s739_s23 = smov (!%p206_p11, %s207_s23), 0  ;;  %506 = vset.pattern.permute.xlu0 %v597_v6  ;;  %507 = vset.pattern.permute.xlu1 %v597_v6  ;;  %241 = vst.msk [vmem:[#allocation4] sm:$0xff] %vm239_vm0, %v598_v7  ;;  %v300_v31 = vshrl.u32 %v245_v0, 7  ;;  %s341_s15 = sshll.u32 %s204_s12, 4  ;;  %s342_s15 = int_to_ptr.vmem [resolvable:$true] %s341_s15 }
  0x17   : > { %s438_s24 = sshll.u32 %s739_s23, 3  ;;  %508 = vset.pattern.permute.xlu2 %v597_v6  ;;  %242 = vst.msk [vmem:[#allocation5] sm:$0xff] %vm239_vm0, %v598_v7  ;;  %s532_s23 = scalar_lea.hbm %s531_s20, 8 }
  0x18   : > { %vm250_vm1 = vcmp.lt.s32.totalorder %v246_v2, 32  ;;  %s214_s27 = scalar_lea.vmem %s726_s0, %s438_s24  ;;  %s224_s30 = scalar_lea.vmem %s727_s1, %s438_s24  ;;  %235 = vst.msk [vmem:[#allocation2] sm:$0x1] %vm234_vm3, %v598_v7  ;;  %v304_v34 = vadd.s32 %v303_v32, %v300_v31 }
  0x19   : > { %v243_v3 = vld [vmem:[%s214_s27] sm:$0xff]  ;;  %p533_p12 = scmp.ne.s32.totalorder %s531_s20, %s532_s23  ;;  %p538_p2 = scmp.lt.s32.totalorder %s536_s26, %s532_s23 }
  0x1a   : > { %v251_v4 = vsel %vm250_vm1, %v243_v3, -inf  ;;  %v244_v8 = vld [vmem:[%s224_s30] sm:$0xff]  ;;  %vm305_vm5 = vcmp.lt.s32.totalorder %v304_v34, 8 }
  0x1b   : > { %v254_v5 = vsel %vm253_vm2, %v251_v4, -inf  ;;  %280 = vperm.xlu1 %507, %v244_v8   ;;  %p534_p13 = pnand %p533_p12, %p654_p4  ;;  %p539_p3 = por %p538_p2, %p537_p1 }
  0x1c   : > { %255 = vmax.xlane.f32.xlu0 %v254_v5  ;;  %v252_v9 = vld [vmem:[#allocation3] sm:$0xff] }
  0x1d   : > { %v269_v26 = vld [vmem:[#allocation4] sm:$0xff]  ;;  %p535_p0 = pneg %p534_p13 }
  0x1e   : > { %v278_v21 = vld [vmem:[#allocation5] sm:$0xff] }
  0x1f   : > { %v307_v47 = vld [vmem:[#allocation2] sm:$0x1]  ;;  %p540_p5 = pnand %p539_p3, %p535_p0 }
  0x8d   : > { %v281_v13 = vpop.permute.xlu1 %280 }
  0x8e   : > { %vm282_vm4 = vcmp.eq.s32.totalorder %v246_v2, %v281_v13 }
  0x8f   : > { %v256_v10 = vpop.xlane.xlu0 %255  ;;  %v283_v14 = vsel %vm282_vm4, %v243_v3, 0.0 }
  0x90   : > { %v257_v11 = vmax.f32 %v252_v9, %v256_v10  ;;  %v284_v15 = vsel %vm253_vm2, %v283_v14, 0.0 }
  0x91   : > { %285 = vadd.xlane.f32.xlu2 %v284_v15 }
  0x92   : > { %v258_v12 = vsub.f32 %v252_v9, %v257_v11  ;;  %277 = vst.msk [vmem:[#allocation3] sm:$0xff] %vm239_vm0, %v257_v11  ;;  %263 = vperm.xlu0 %506, %v257_v11  }
  0x94   : > { %v259_v24 = vmul.f32 1.442695, %v258_v12 }
  0x99   : > { %v292_v36 = vld [vmem:[#allocation3] sm:$0xff] }
 0x104   : > { %v264_v16 = vpop.permute.xlu0 %263  ;;  %v286_v22 = vpop.xlane.xlu2 %285 }
 0x105   : > { %v266_v17 = vsub.f32 %v251_v4, %v264_v16  ;;  %v287_v23 = vadd.f32 %v286_v22, %v278_v21 }
 0x107   : > { %v267_v18 = vmul.f32 1.442695, %v266_v17  ;;  %288 = vst.msk [vmem:[#allocation5] sm:$0xff] %vm239_vm0, %v287_v23 }
 0x109   : > { %510 = vpow2.f32 %v267_v18 }
 0x10a   : > { %512 = vpow2.f32 %v259_v24 }
 0x10e   : > { %v297_v37 = vld [vmem:[#allocation5] sm:$0xff] }
 0x10f   : > { %v511_v19 = vpop.eup %510 }
 0x110   : > { %v271_v20 = vsel %vm253_vm2, %v511_v19, 0.0  ;;  %v513_v25 = vpop.eup %512 }
 0x111   : > { %272 = vadd.xlane.f32.xlu1 %v271_v20  ;;  %v270_v27 = vmul.f32 %v513_v25, %v269_v26 }
 0x184   : > { %v273_v28 = vpop.xlane.xlu1 %272 }
 0x185   : > { %v274_v29 = vadd.f32 %v273_v28, %v270_v27 }
 0x187   : > { %276 = vst.msk [vmem:[#allocation4] sm:$0xff] %vm239_vm0, %v274_v29 }
 0x18e   : > { %v293_v30 = vld [vmem:[#allocation4] sm:$0xff] }
 0x18f   : > { %514 = vlog2.f32 %v293_v30 }
 0x195   : > { %v515_v33 = vpop.eup %514 }
 0x196   : > { %v295_v35 = vmul.f32 0.6931472, %v515_v33 }
 0x198   : > { %v296_v38 = vadd.f32 %v295_v35, %v292_v36 }
 0x19a   : > { %v298_v39 = vsub.f32 %v296_v38, %v297_v37 }
 0x19c   : > { %v306_v40 = vsel %vm305_vm5, %v298_v39, 0.0 }
 0x19d   : > { %v308_v41 = vsel %vm239_vm0, %v306_v40, 0.0 }
 0x19e   : > { %v309_v42 = vrot.slane %v308_v41, 4 }
 0x1a0   : > { %v310_v43 = vadd.f32 %v309_v42, %v308_v41 }
 0x1a2   : > { %v311_v44 = vrot.slane %v310_v43, 2 }
 0x1a4   : > { %v312_v45 = vadd.f32 %v311_v44, %v310_v43 }
 0x1a6   : > { %v313_v46 = vrot.slane %v312_v45, 1 }
 0x1a8   : > { %v314_v48 = vadd.f32 %v313_v46, %v312_v45 }
 0x1aa   : > { %v315_v49 = vadd.f32 %v314_v48, %v307_v47 }
 0x1ac   : > { %317 = vst.msk [vmem:[#allocation2] sm:$0x1] %vm234_vm3, %v315_v49 }
 0x1b3   : > { %v509_v50 = vld [vmem:[#allocation2] ss:$0 sm:$0xff] }
 0x1b4   : > { %324 = vperm.xlu2 %508, %v509_v50  }
 0x20e   : > { %v325_v51 = vpop.permute.xlu2 %324 }
 0x20f   : > { %327 = vst [vmem:[%s204_s12] sm:$0xff] %v325_v51 }
 0x210   : > { %543 = shalt.err (!%p540_p5)
}
 0x211   : > { %448 = dma.vmem_to_hbm [thread:$0]  (%p654_p4), %s342_s15, 128, %s344_s16, %s329_s18  }
 0x212 PF: > { %p454_p6 = scmp.ge.s32.totalorder %s594_s14, 2  ;;  %s355_s29 = sand.u32 1, %s574_s9  }
 0x213   : > { %s356_s30 = scalar_lea.sflag [#allocation7], %s355_s29 }
 0x214   : > { %p451_p7 = pnand %p454_p6, %p661_p8 }
 0x216   : > { %p452_p9 = pneg %p451_p7 }
 0x218   : > { %569 = dma.done.wait (%p452_p9), %s356_s30, 128  }
 0x219   : > { %571 = vsyncadd (%p452_p9), %s356_s30, 4294967168  ;;  %s15_s14 = sadd.s32 1, %s594_s14   ;;  %s731_s9 = smov %s578_s10 }
 0x21a   : > { %p12_p10 = scmp.ge.s32.totalorder %s15_s14, 4   ;;  %s732_s10 = smov %s582_s11 }
 0x21b   : > { %s733_s11 = smov %s667_s22  ;;  %s734_s12 = smov %s590_s13 }
 0x21c   : > { %s735_s13 = smov %s737_s17  ;;  %14 = sbr.rel (!%p12_p10) target bundleno = 4 (0x4), region = 82 }
 0x221   :  { %362 = vsyncpa [#allocation7], 1 }
 0x222   :  { %364 = vsyncpa [#allocation7 + $0x1], 1 }

</bundles_post_ra>
